<compile_context>
chip_gen: v5e
topology: v5e:2x2
jax: 0.10.0
libtpu: 0.0.40
codegen_flags: <defaults>
</compile_context>

<pallas_src>
import functools
import math

import jax
import jax.numpy as jnp
import numpy as np
from jax.experimental import pallas as pl
from jax.experimental.pallas import tpu as pltpu


def _round_up(x, m):
    return ((x + m - 1) // m) * m


def _unpack_kernel(bs_ref, loc_ref, sstart_ref, data_ref, out_ref, buf, sem, *,
                   S, TS, G, NG, U, B_pad, F, W_dma, W_buf, n_slots):
    """One grid step = S sub-chunks of TS timesteps each (TT = S*TS timesteps).

    bs_ref    : (T_pad,)          SMEM  batch size per timestep (0 for pad timesteps)
    loc_ref   : (T_pad,)          SMEM  row offset of timestep t inside its sub-chunk buffer
    sstart_ref: (C*S,)            SMEM  HBM row offset of each sub-chunk's DMA window
    data_ref  : (N, F)            HBM   packed rows (memory_space=pl.ANY, no auto-DMA)
    out_ref   : (B_pad, TT*F)     VMEM  batch-first, lane-dense output block
    buf       : (n_slots*W_buf,F) VMEM  double-buffered scratch; first W_dma rows
                                        of each slot are filled by the DMA
    """
    c = pl.program_id(0)

    def copy(s_local):
        slot = s_local % n_slots
        s = c * S + s_local
        return pltpu.make_async_copy(
            data_ref.at[pl.ds(sstart_ref[s], W_dma)],
            buf.at[pl.ds(slot * W_buf, W_dma)],
            sem.at[slot])

    copy(0).start()                               # per-step self-priming ("parallel"-safe)

    row_ids = jax.lax.broadcasted_iota(jnp.int32, (B_pad, 1), 0)   # hoisted

    def emit_group(slot_row0, t0, col_base, g):
        # One lane-aligned (B_pad, G*F) store covering G consecutive timesteps.
        # Rows >= bs (and pad timesteps) read junk from the scratch slack; the
        # select discards them, and host-side asserts guarantee the reads never
        # leave the buf allocation.  (Assumes B_pad*G*F stays a modest number of
        # vregs; F is typically 128-friendly so G is small.)
        cols = []
        for j in range(G):                        # static unroll, G = 128/gcd(F,128)
            t = t0 + g * G + j
            bs = bs_ref[t]
            loc = loc_ref[t]
            chunk = buf[pl.ds(slot_row0 + loc, B_pad), :]          # (B_pad, F)
            cols.append(jnp.where(row_ids < bs, chunk, 0).astype(out_ref.dtype))
        val = cols[0] if G == 1 else jnp.concatenate(cols, axis=1)  # (B_pad, G*F)
        col0 = col_base + g * (G * F)             # multiple of G*F (>= 128)
        if not isinstance(col0, int):
            col0 = pl.multiple_of(col0, 128)
        out_ref[:, pl.ds(col0, G * F)] = val

    for s_local in range(S):                      # static, S <= 4
        slot_row0 = (s_local % n_slots) * W_buf
        if s_local + 1 < S:
            copy(s_local + 1).start()             # prefetch next sub-chunk before waiting
        copy(s_local).wait()
        t0 = c * (S * TS) + s_local * TS          # first (padded-global) timestep of sub-chunk
        col_base = s_local * TS * F
        if NG <= 4:
            for g in range(NG):                   # small static unroll
                emit_group(slot_row0, t0, col_base, g)
        else:
            def body(i, carry):                   # bounded code size + bounded live ranges
                for j in range(U):
                    emit_group(slot_row0, t0, col_base, i * U + j)
                return carry
            jax.lax.fori_loop(0, NG // U, body, 0)


def pad_packed_sequence_pallas(data, batch_sizes, *, target_block_bytes=2 << 20,
                               max_subchunks=4):
    """data: (N, F) packed rows; batch_sizes: (T,) descending ints (host numpy).

    Returns (out, lengths): out (B, T, F) batch-first padded tensor,
    lengths (B,) int32 (torch returns int64 on CPU; value-identical).
    Padding value is 0 (torch default).
    """
    batch_sizes = np.asarray(batch_sizes, dtype=np.int64)
    T = int(batch_sizes.shape[0])
    B = int(batch_sizes[0])
    N, F = int(data.shape[0]), int(data.shape[1])
    itemsize = int(jnp.dtype(data.dtype).itemsize)
    sub = max(8, 32 // itemsize)                  # sublane multiple (8 f32 / 16 bf16 / 32 i8)
    G = 128 // math.gcd(F, 128)                   # timesteps per lane-aligned store group
    B_pad = _round_up(B, sub)

    # lengths[b] = #{t : batch_sizes[t] > b}  -- pure host work.
    lengths = (batch_sizes[None, :] > np.arange(B, dtype=np.int64)[:, None]).sum(1).astype(np.int32)

    # Exclusive cumsum -> per-timestep row offset into the packed data.
    offsets = np.zeros((T,), np.int64)
    offsets[1:] = np.cumsum(batch_sizes[:-1], dtype=np.int64)

    # ---- tiling --------------------------------------------------------------
    row_bytes = B_pad * F * itemsize              # output bytes per timestep
    tt = max(1, int(target_block_bytes) // row_bytes)
    tt = min(tt, T)
    if T >= 2 * G:
        tt = min(tt, -(-T // 2))                  # >= 2 grid steps when possible (v7x megacore)
    tt = _round_up(max(tt, 1), G)
    S = max(1, min(int(max_subchunks), tt // G))  # sub-chunks per step (in-step DMA overlap)
    tt = _round_up(tt, S * G)
    TS = tt // S                                  # timesteps per sub-chunk DMA
    NG = TS // G                                  # store groups per sub-chunk
    C = -(-T // tt)                               # grid steps
    T_pad = C * tt
    n_slots = 2 if S > 1 else 1
    U = 1
    if NG > 4:
        for u in (4, 2):
            if NG % u == 0:
                U = u
                break

    # ---- per-sub-chunk DMA windows (sized from actual packed spans) ----------
    n_sub = C * S
    sstart = np.zeros((n_sub,), np.int64)
    send = np.zeros((n_sub,), np.int64)
    for s in range(n_sub):
        ft = s * TS
        lt = min((s + 1) * TS, T) - 1
        if ft < T:
            sstart[s] = (offsets[ft] // sub) * sub
            send[s] = offsets[lt] + batch_sizes[lt]
    W_need = int(np.max(np.maximum(send - sstart, 0)))
    W_dma = min(_round_up(max(W_need, 1), sub), N)
    # Clamp starts so every window stays inside the packed buffer (no padded copy
    # of `data`); clamping only moves a start earlier, so coverage is preserved.
    sstart = np.clip(sstart, 0, max(N - W_dma, 0))

    bs_pad = np.zeros((T_pad,), np.int32)
    bs_pad[:T] = batch_sizes
    loc = np.zeros((T_pad,), np.int32)
    loc[:T] = (offsets - sstart[np.arange(T) // TS]).astype(np.int32)

    # Scratch slack so fixed-size B_pad-row reads never leave the allocation.
    W_buf = _round_up(int(max(W_dma, B_pad, int(loc[:T].max()) + B_pad)), sub)
    assert int(loc[:T].max()) + B_pad <= W_buf, "junk reads must stay inside scratch"
    assert W_dma <= W_buf and np.all(loc[:T] >= 0) and np.all(sstart + W_dma <= N)

    vmem_need = (2 * B_pad * tt * F * itemsize
                 + n_slots * W_buf * _round_up(F, 128) * itemsize)
    vmem_limit = int(min(64 << 20, max(32 << 20, 2 * vmem_need)))

    grid_spec = pltpu.PrefetchScalarGridSpec(
        num_scalar_prefetch=3,                    # bs_pad, loc, sstart -> SMEM
        grid=(C,),
        in_specs=[pl.BlockSpec(memory_space=pl.ANY)],     # packed data stays in HBM
        out_specs=pl.BlockSpec((B_pad, tt * F), lambda c, bs, lo, ss: (0, c)),
        scratch_shapes=[
            pltpu.VMEM((n_slots * W_buf, F), data.dtype),
            pltpu.SemaphoreType.DMA((n_slots,)),
        ],
    )

    out2d = pl.pallas_call(
        functools.partial(_unpack_kernel, S=S, TS=TS, G=G, NG=NG, U=U,
                          B_pad=B_pad, F=F, W_dma=W_dma, W_buf=W_buf,
                          n_slots=n_slots),
        out_shape=jax.ShapeDtypeStruct((B_pad, T_pad * F), data.dtype),
        grid_spec=grid_spec,
        compiler_params=pltpu.CompilerParams(
            dimension_semantics=("parallel",),
            vmem_limit_bytes=vmem_limit),
        cost_estimate=pl.CostEstimate(
            flops=0, transcendentals=0,
            bytes_accessed=N * F * itemsize + B_pad * T_pad * F * itemsize),
    )(jnp.asarray(bs_pad), jnp.asarray(loc),
      jnp.asarray(sstart.astype(np.int32)), data)

    out = out2d.reshape(B_pad, T_pad, F)[:B, :T, :]   # trailing split + cheap leading slices
    return out, jnp.asarray(lengths)
    # TODO(synk): self.max_length (total_length) is always None in the module; a
    # non-None total_length (and a non-zero padding_value) would only change the
    # host-side padding of T_pad / the `0` fill constant.


def _pack_padded(padded, lengths):
    """Emulate torch.pack_padded_sequence(batch_first=True) on numpy (test glue)."""
    B, T, F = padded.shape
    lengths = np.asarray(lengths)
    batch_sizes = np.array([(lengths > t).sum() for t in range(T)], dtype=np.int64)
    rows = [padded[:batch_sizes[t], t, :] for t in range(T) if batch_sizes[t] > 0]
    data = np.concatenate(rows, axis=0)
    return data, batch_sizes


if __name__ == "__main__":
    def run_case(key, lengths, F, **kw):
        lengths = np.asarray(lengths, dtype=np.int64)
        B, T = len(lengths), int(lengths[0])
        x = jax.random.normal(key, (B, T, F), dtype=jnp.float32)
        t_ids = jnp.arange(T)[None, :, None]
        ref = jnp.where(t_ids < jnp.asarray(lengths)[:, None, None], x, 0.0)
        data_np, batch_sizes = _pack_padded(np.asarray(ref), lengths)
        out, out_len = pad_packed_sequence_pallas(jnp.asarray(data_np), batch_sizes, **kw)
        out = jax.block_until_ready(out)
        out_len = jax.block_until_ready(out_len)
        assert out.shape == (B, T, F) and out.dtype == jnp.float32
        np.testing.assert_allclose(np.asarray(out), np.asarray(ref), rtol=0, atol=0)
        np.testing.assert_array_equal(np.asarray(out_len), lengths.astype(np.int32))

    k1, k2 = jax.random.split(jax.random.PRNGKey(0))

    # B=5 (not a sublane multiple), T=15 (padded to 16): 2 grid steps, S=2 pipeline.
    run_case(k1, [15, 12, 9, 5, 2], 32)
    # Larger ragged case: default S=4 in-step DMA pipeline, 2 grid steps.
    run_case(k2, [96, 77, 50, 23, 4], 32)
    # Single DMA per step + fori_loop unpack path (NG=12, unrolled by 4).
    run_case(k2, [96, 77, 50, 23, 4], 32, max_subchunks=1)
    # Small tiles -> 6 grid steps.
    run_case(k2, [96, 77, 50, 23, 4], 32, max_subchunks=1, target_block_bytes=16 * 1024)

    print("KERNEL_OK")
</pallas_src>

<mosaic_0001>
module attributes {stable_mosaic.version = 11 : i64} {
  func.func @_unpack_kernel(%arg0: i32, %arg1: memref<16xi32, #tpu.memory_space<smem>>, %arg2: memref<16xi32, #tpu.memory_space<smem>>, %arg3: memref<4xi32, #tpu.memory_space<smem>>, %arg4: memref<43x32xf32, #tpu.memory_space<any>>, %arg5: memref<8x256xf32, #tpu.memory_space<vmem>>, %arg6: memref<64x32xf32, #tpu.memory_space<vmem>>, %arg7: memref<2x!tpu.dma_semaphore, #tpu.memory_space<semaphore_mem>>) attributes {dimension_semantics = [#tpu.dimension_semantics<parallel>], iteration_bounds = array<i64: 2>, scalar_prefetch = 3 : i64, scratch_operands = 2 : i64, tpu.core_type = #tpu.core_type<tc>, window_params = [{}, {transform_indices = @transform_1, window_bounds = array<i64: 8, 256>}]} {
    %c2_i32 = arith.constant 2 : i32
    %0 = arith.muli %arg0, %c2_i32 : i32
    %c0_i32 = arith.constant 0 : i32
    %1 = arith.addi %0, %c0_i32 : i32
    %2 = arith.index_cast %1 : i32 to index
    %3 = memref.load %arg3[%2] : memref<4xi32, #tpu.memory_space<smem>>
    %c0_i32_0 = arith.constant 0 : i32
    %c0_i32_1 = arith.constant 0 : i32
    %4 = tpu.memref_slice %arg4[%3, %c0_i32_1] : memref<43x32xf32, #tpu.memory_space<any>> -> memref<24x32xf32, #tpu.memory_space<any>>
    %c0_i32_2 = arith.constant 0 : i32
    %c0_i32_3 = arith.constant 0 : i32
    %5 = tpu.memref_slice %arg6[%c0_i32_2, %c0_i32_3] : memref<64x32xf32, #tpu.memory_space<vmem>> -> memref<24x32xf32, #tpu.memory_space<vmem>>
    %6 = tpu.memref_slice %arg7[%c0_i32_0] : memref<2x!tpu.dma_semaphore, #tpu.memory_space<semaphore_mem>> -> memref<1x!tpu.dma_semaphore, #tpu.memory_space<semaphore_mem>>
    %7 = tpu.memref_squeeze %6 : memref<1x!tpu.dma_semaphore, #tpu.memory_space<semaphore_mem>> -> memref<!tpu.dma_semaphore, #tpu.memory_space<semaphore_mem>>
    tpu.enqueue_dma source(%4 : memref<24x32xf32, #tpu.memory_space<any>>) target(%5 : memref<24x32xf32, #tpu.memory_space<vmem>>) target_semaphore(%7 : memref<!tpu.dma_semaphore, #tpu.memory_space<semaphore_mem>>)
    %8 = tpu.iota {dimensions = array<i32: 0>} : vector<8x1xi32>
    %c2_i32_4 = arith.constant 2 : i32
    %9 = arith.muli %arg0, %c2_i32_4 : i32
    %c1_i32 = arith.constant 1 : i32
    %10 = arith.addi %9, %c1_i32 : i32
    %11 = arith.index_cast %10 : i32 to index
    %12 = memref.load %arg3[%11] : memref<4xi32, #tpu.memory_space<smem>>
    %c1_i32_5 = arith.constant 1 : i32
    %c0_i32_6 = arith.constant 0 : i32
    %13 = tpu.memref_slice %arg4[%12, %c0_i32_6] : memref<43x32xf32, #tpu.memory_space<any>> -> memref<24x32xf32, #tpu.memory_space<any>>
    %c32_i32 = arith.constant 32 : i32
    %c0_i32_7 = arith.constant 0 : i32
    %14 = tpu.memref_slice %arg6[%c32_i32, %c0_i32_7] : memref<64x32xf32, #tpu.memory_space<vmem>> -> memref<24x32xf32, #tpu.memory_space<vmem>>
    %15 = tpu.memref_slice %arg7[%c1_i32_5] : memref<2x!tpu.dma_semaphore, #tpu.memory_space<semaphore_mem>> -> memref<1x!tpu.dma_semaphore, #tpu.memory_space<semaphore_mem>>
    %16 = tpu.memref_squeeze %15 : memref<1x!tpu.dma_semaphore, #tpu.memory_space<semaphore_mem>> -> memref<!tpu.dma_semaphore, #tpu.memory_space<semaphore_mem>>
    tpu.enqueue_dma source(%13 : memref<24x32xf32, #tpu.memory_space<any>>) target(%14 : memref<24x32xf32, #tpu.memory_space<vmem>>) target_semaphore(%16 : memref<!tpu.dma_semaphore, #tpu.memory_space<semaphore_mem>>)
    %c2_i32_8 = arith.constant 2 : i32
    %17 = arith.muli %arg0, %c2_i32_8 : i32
    %c0_i32_9 = arith.constant 0 : i32
    %18 = arith.addi %17, %c0_i32_9 : i32
    %19 = arith.index_cast %18 : i32 to index
    %20 = memref.load %arg3[%19] : memref<4xi32, #tpu.memory_space<smem>>
    %c0_i32_10 = arith.constant 0 : i32
    %c0_i32_11 = arith.constant 0 : i32
    %21 = tpu.memref_slice %arg4[%20, %c0_i32_11] : memref<43x32xf32, #tpu.memory_space<any>> -> memref<24x32xf32, #tpu.memory_space<any>>
    %c0_i32_12 = arith.constant 0 : i32
    %c0_i32_13 = arith.constant 0 : i32
    %22 = tpu.memref_slice %arg6[%c0_i32_12, %c0_i32_13] : memref<64x32xf32, #tpu.memory_space<vmem>> -> memref<24x32xf32, #tpu.memory_space<vmem>>
    %23 = tpu.memref_slice %arg7[%c0_i32_10] : memref<2x!tpu.dma_semaphore, #tpu.memory_space<semaphore_mem>> -> memref<1x!tpu.dma_semaphore, #tpu.memory_space<semaphore_mem>>
    %24 = tpu.memref_squeeze %23 : memref<1x!tpu.dma_semaphore, #tpu.memory_space<semaphore_mem>> -> memref<!tpu.dma_semaphore, #tpu.memory_space<semaphore_mem>>
    tpu.wait_dma2 semaphore(%24 : memref<!tpu.dma_semaphore, #tpu.memory_space<semaphore_mem>>) src(%21 : memref<24x32xf32, #tpu.memory_space<any>>) dst(%22 : memref<24x32xf32, #tpu.memory_space<vmem>>)
    %c8_i32 = arith.constant 8 : i32
    %25 = arith.muli %arg0, %c8_i32 : i32
    %c0_i32_14 = arith.constant 0 : i32
    %26 = arith.addi %25, %c0_i32_14 : i32
    %c0_i32_15 = arith.constant 0 : i32
    %27 = arith.addi %26, %c0_i32_15 : i32
    %c0_i32_16 = arith.constant 0 : i32
    %28 = arith.addi %27, %c0_i32_16 : i32
    %29 = arith.index_cast %28 : i32 to index
    %30 = memref.load %arg1[%29] : memref<16xi32, #tpu.memory_space<smem>>
    %31 = arith.index_cast %28 : i32 to index
    %32 = memref.load %arg2[%31] : memref<16xi32, #tpu.memory_space<smem>>
    %c0_i32_17 = arith.constant 0 : i32
    %33 = arith.addi %c0_i32_17, %32 : i32
    %34 = arith.index_cast %33 : i32 to index
    %c0 = arith.constant 0 : index
    %35 = vector.load %arg6[%34, %c0] : memref<64x32xf32, #tpu.memory_space<vmem>>, vector<8x32xf32>
    %36 = vector.broadcast %30 : i32 to vector<8x1xi32>
    %37 = arith.cmpi slt, %8, %36 : vector<8x1xi32>
    %c0_i32_18 = arith.constant 0 : i32
    %38 = arith.sitofp %c0_i32_18 : i32 to f32
    %39 = vector.shape_cast %37 : vector<8x1xi1> to vector<8x1xi1>
    %40 = vector.broadcast %39 : vector<8x1xi1> to vector<8x32xi1>
    %41 = vector.broadcast %38 : f32 to vector<8x32xf32>
    %42 = arith.select %40, %35, %41 : vector<8x32xi1>, vector<8x32xf32>
    %c0_i32_19 = arith.constant 0 : i32
    %43 = arith.addi %26, %c0_i32_19 : i32
    %c1_i32_20 = arith.constant 1 : i32
    %44 = arith.addi %43, %c1_i32_20 : i32
    %45 = arith.index_cast %44 : i32 to index
    %46 = memref.load %arg1[%45] : memref<16xi32, #tpu.memory_space<smem>>
    %47 = arith.index_cast %44 : i32 to index
    %48 = memref.load %arg2[%47] : memref<16xi32, #tpu.memory_space<smem>>
    %c0_i32_21 = arith.constant 0 : i32
    %49 = arith.addi %c0_i32_21, %48 : i32
    %50 = arith.index_cast %49 : i32 to index
    %c0_22 = arith.constant 0 : index
    %51 = vector.load %arg6[%50, %c0_22] : memref<64x32xf32, #tpu.memory_space<vmem>>, vector<8x32xf32>
    %52 = vector.broadcast %46 : i32 to vector<8x1xi32>
    %53 = arith.cmpi slt, %8, %52 : vector<8x1xi32>
    %c0_i32_23 = arith.constant 0 : i32
    %54 = arith.sitofp %c0_i32_23 : i32 to f32
    %55 = vector.shape_cast %53 : vector<8x1xi1> to vector<8x1xi1>
    %56 = vector.broadcast %55 : vector<8x1xi1> to vector<8x32xi1>
    %57 = vector.broadcast %54 : f32 to vector<8x32xf32>
    %58 = arith.select %56, %51, %57 : vector<8x32xi1>, vector<8x32xf32>
    %c0_i32_24 = arith.constant 0 : i32
    %59 = arith.addi %26, %c0_i32_24 : i32
    %c2_i32_25 = arith.constant 2 : i32
    %60 = arith.addi %59, %c2_i32_25 : i32
    %61 = arith.index_cast %60 : i32 to index
    %62 = memref.load %arg1[%61] : memref<16xi32, #tpu.memory_space<smem>>
    %63 = arith.index_cast %60 : i32 to index
    %64 = memref.load %arg2[%63] : memref<16xi32, #tpu.memory_space<smem>>
    %c0_i32_26 = arith.constant 0 : i32
    %65 = arith.addi %c0_i32_26, %64 : i32
    %66 = arith.index_cast %65 : i32 to index
    %c0_27 = arith.constant 0 : index
    %67 = vector.load %arg6[%66, %c0_27] : memref<64x32xf32, #tpu.memory_space<vmem>>, vector<8x32xf32>
    %68 = vector.broadcast %62 : i32 to vector<8x1xi32>
    %69 = arith.cmpi slt, %8, %68 : vector<8x1xi32>
    %c0_i32_28 = arith.constant 0 : i32
    %70 = arith.sitofp %c0_i32_28 : i32 to f32
    %71 = vector.shape_cast %69 : vector<8x1xi1> to vector<8x1xi1>
    %72 = vector.broadcast %71 : vector<8x1xi1> to vector<8x32xi1>
    %73 = vector.broadcast %70 : f32 to vector<8x32xf32>
    %74 = arith.select %72, %67, %73 : vector<8x32xi1>, vector<8x32xf32>
    %c0_i32_29 = arith.constant 0 : i32
    %75 = arith.addi %26, %c0_i32_29 : i32
    %c3_i32 = arith.constant 3 : i32
    %76 = arith.addi %75, %c3_i32 : i32
    %77 = arith.index_cast %76 : i32 to index
    %78 = memref.load %arg1[%77] : memref<16xi32, #tpu.memory_space<smem>>
    %79 = arith.index_cast %76 : i32 to index
    %80 = memref.load %arg2[%79] : memref<16xi32, #tpu.memory_space<smem>>
    %c0_i32_30 = arith.constant 0 : i32
    %81 = arith.addi %c0_i32_30, %80 : i32
    %82 = arith.index_cast %81 : i32 to index
    %c0_31 = arith.constant 0 : index
    %83 = vector.load %arg6[%82, %c0_31] : memref<64x32xf32, #tpu.memory_space<vmem>>, vector<8x32xf32>
    %84 = vector.broadcast %78 : i32 to vector<8x1xi32>
    %85 = arith.cmpi slt, %8, %84 : vector<8x1xi32>
    %c0_i32_32 = arith.constant 0 : i32
    %86 = arith.sitofp %c0_i32_32 : i32 to f32
    %87 = vector.shape_cast %85 : vector<8x1xi1> to vector<8x1xi1>
    %88 = vector.broadcast %87 : vector<8x1xi1> to vector<8x32xi1>
    %89 = vector.broadcast %86 : f32 to vector<8x32xf32>
    %90 = arith.select %88, %83, %89 : vector<8x32xi1>, vector<8x32xf32>
    %91 = tpu.concatenate %42, %58, %74, %90 in 1 : vector<8x32xf32>, vector<8x32xf32>, vector<8x32xf32>, vector<8x32xf32> -> vector<8x128xf32>
    %c0_33 = arith.constant 0 : index
    %c0_34 = arith.constant 0 : index
    %92 = vector.load %arg5[%c0_33, %c0_34] : memref<8x256xf32, #tpu.memory_space<vmem>>, vector<8x128xf32>
    tpu.vector_store %arg5[%c0_33, %c0_34], %91 {strides = array<i32>} : memref<8x256xf32, #tpu.memory_space<vmem>>, vector<8x128xf32>,
    %c2_i32_35 = arith.constant 2 : i32
    %93 = arith.muli %arg0, %c2_i32_35 : i32
    %c1_i32_36 = arith.constant 1 : i32
    %94 = arith.addi %93, %c1_i32_36 : i32
    %95 = arith.index_cast %94 : i32 to index
    %96 = memref.load %arg3[%95] : memref<4xi32, #tpu.memory_space<smem>>
    %c1_i32_37 = arith.constant 1 : i32
    %c0_i32_38 = arith.constant 0 : i32
    %97 = tpu.memref_slice %arg4[%96, %c0_i32_38] : memref<43x32xf32, #tpu.memory_space<any>> -> memref<24x32xf32, #tpu.memory_space<any>>
    %c32_i32_39 = arith.constant 32 : i32
    %c0_i32_40 = arith.constant 0 : i32
    %98 = tpu.memref_slice %arg6[%c32_i32_39, %c0_i32_40] : memref<64x32xf32, #tpu.memory_space<vmem>> -> memref<24x32xf32, #tpu.memory_space<vmem>>
    %99 = tpu.memref_slice %arg7[%c1_i32_37] : memref<2x!tpu.dma_semaphore, #tpu.memory_space<semaphore_mem>> -> memref<1x!tpu.dma_semaphore, #tpu.memory_space<semaphore_mem>>
    %100 = tpu.memref_squeeze %99 : memref<1x!tpu.dma_semaphore, #tpu.memory_space<semaphore_mem>> -> memref<!tpu.dma_semaphore, #tpu.memory_space<semaphore_mem>>
    tpu.wait_dma2 semaphore(%100 : memref<!tpu.dma_semaphore, #tpu.memory_space<semaphore_mem>>) src(%97 : memref<24x32xf32, #tpu.memory_space<any>>) dst(%98 : memref<24x32xf32, #tpu.memory_space<vmem>>)
    %c8_i32_41 = arith.constant 8 : i32
    %101 = arith.muli %arg0, %c8_i32_41 : i32
    %c4_i32 = arith.constant 4 : i32
    %102 = arith.addi %101, %c4_i32 : i32
    %c0_i32_42 = arith.constant 0 : i32
    %103 = arith.addi %102, %c0_i32_42 : i32
    %c0_i32_43 = arith.constant 0 : i32
    %104 = arith.addi %103, %c0_i32_43 : i32
    %105 = arith.index_cast %104 : i32 to index
    %106 = memref.load %arg1[%105] : memref<16xi32, #tpu.memory_space<smem>>
    %107 = arith.index_cast %104 : i32 to index
    %108 = memref.load %arg2[%107] : memref<16xi32, #tpu.memory_space<smem>>
    %c32_i32_44 = arith.constant 32 : i32
    %109 = arith.addi %c32_i32_44, %108 : i32
    %110 = arith.index_cast %109 : i32 to index
    %c0_45 = arith.constant 0 : index
    %111 = vector.load %arg6[%110, %c0_45] : memref<64x32xf32, #tpu.memory_space<vmem>>, vector<8x32xf32>
    %112 = vector.broadcast %106 : i32 to vector<8x1xi32>
    %113 = arith.cmpi slt, %8, %112 : vector<8x1xi32>
    %c0_i32_46 = arith.constant 0 : i32
    %114 = arith.sitofp %c0_i32_46 : i32 to f32
    %115 = vector.shape_cast %113 : vector<8x1xi1> to vector<8x1xi1>
    %116 = vector.broadcast %115 : vector<8x1xi1> to vector<8x32xi1>
    %117 = vector.broadcast %114 : f32 to vector<8x32xf32>
    %118 = arith.select %116, %111, %117 : vector<8x32xi1>, vector<8x32xf32>
    %c0_i32_47 = arith.constant 0 : i32
    %119 = arith.addi %102, %c0_i32_47 : i32
    %c1_i32_48 = arith.constant 1 : i32
    %120 = arith.addi %119, %c1_i32_48 : i32
    %121 = arith.index_cast %120 : i32 to index
    %122 = memref.load %arg1[%121] : memref<16xi32, #tpu.memory_space<smem>>
    %123 = arith.index_cast %120 : i32 to index
    %124 = memref.load %arg2[%123] : memref<16xi32, #tpu.memory_space<smem>>
    %c32_i32_49 = arith.constant 32 : i32
    %125 = arith.addi %c32_i32_49, %124 : i32
    %126 = arith.index_cast %125 : i32 to index
    %c0_50 = arith.constant 0 : index
    %127 = vector.load %arg6[%126, %c0_50] : memref<64x32xf32, #tpu.memory_space<vmem>>, vector<8x32xf32>
    %128 = vector.broadcast %122 : i32 to vector<8x1xi32>
    %129 = arith.cmpi slt, %8, %128 : vector<8x1xi32>
    %c0_i32_51 = arith.constant 0 : i32
    %130 = arith.sitofp %c0_i32_51 : i32 to f32
    %131 = vector.shape_cast %129 : vector<8x1xi1> to vector<8x1xi1>
    %132 = vector.broadcast %131 : vector<8x1xi1> to vector<8x32xi1>
    %133 = vector.broadcast %130 : f32 to vector<8x32xf32>
    %134 = arith.select %132, %127, %133 : vector<8x32xi1>, vector<8x32xf32>
    %c0_i32_52 = arith.constant 0 : i32
    %135 = arith.addi %102, %c0_i32_52 : i32
    %c2_i32_53 = arith.constant 2 : i32
    %136 = arith.addi %135, %c2_i32_53 : i32
    %137 = arith.index_cast %136 : i32 to index
    %138 = memref.load %arg1[%137] : memref<16xi32, #tpu.memory_space<smem>>
    %139 = arith.index_cast %136 : i32 to index
    %140 = memref.load %arg2[%139] : memref<16xi32, #tpu.memory_space<smem>>
    %c32_i32_54 = arith.constant 32 : i32
    %141 = arith.addi %c32_i32_54, %140 : i32
    %142 = arith.index_cast %141 : i32 to index
    %c0_55 = arith.constant 0 : index
    %143 = vector.load %arg6[%142, %c0_55] : memref<64x32xf32, #tpu.memory_space<vmem>>, vector<8x32xf32>
    %144 = vector.broadcast %138 : i32 to vector<8x1xi32>
    %145 = arith.cmpi slt, %8, %144 : vector<8x1xi32>
    %c0_i32_56 = arith.constant 0 : i32
    %146 = arith.sitofp %c0_i32_56 : i32 to f32
    %147 = vector.shape_cast %145 : vector<8x1xi1> to vector<8x1xi1>
    %148 = vector.broadcast %147 : vector<8x1xi1> to vector<8x32xi1>
    %149 = vector.broadcast %146 : f32 to vector<8x32xf32>
    %150 = arith.select %148, %143, %149 : vector<8x32xi1>, vector<8x32xf32>
    %c0_i32_57 = arith.constant 0 : i32
    %151 = arith.addi %102, %c0_i32_57 : i32
    %c3_i32_58 = arith.constant 3 : i32
    %152 = arith.addi %151, %c3_i32_58 : i32
    %153 = arith.index_cast %152 : i32 to index
    %154 = memref.load %arg1[%153] : memref<16xi32, #tpu.memory_space<smem>>
    %155 = arith.index_cast %152 : i32 to index
    %156 = memref.load %arg2[%155] : memref<16xi32, #tpu.memory_space<smem>>
    %c32_i32_59 = arith.constant 32 : i32
    %157 = arith.addi %c32_i32_59, %156 : i32
    %158 = arith.index_cast %157 : i32 to index
    %c0_60 = arith.constant 0 : index
    %159 = vector.load %arg6[%158, %c0_60] : memref<64x32xf32, #tpu.memory_space<vmem>>, vector<8x32xf32>
    %160 = vector.broadcast %154 : i32 to vector<8x1xi32>
    %161 = arith.cmpi slt, %8, %160 : vector<8x1xi32>
    %c0_i32_61 = arith.constant 0 : i32
    %162 = arith.sitofp %c0_i32_61 : i32 to f32
    %163 = vector.shape_cast %161 : vector<8x1xi1> to vector<8x1xi1>
    %164 = vector.broadcast %163 : vector<8x1xi1> to vector<8x32xi1>
    %165 = vector.broadcast %162 : f32 to vector<8x32xf32>
    %166 = arith.select %164, %159, %165 : vector<8x32xi1>, vector<8x32xf32>
    %167 = tpu.concatenate %118, %134, %150, %166 in 1 : vector<8x32xf32>, vector<8x32xf32>, vector<8x32xf32>, vector<8x32xf32> -> vector<8x128xf32>
    %c0_62 = arith.constant 0 : index
    %c128 = arith.constant 128 : index
    %168 = vector.load %arg5[%c0_62, %c128] : memref<8x256xf32, #tpu.memory_space<vmem>>, vector<8x128xf32>
    tpu.vector_store %arg5[%c0_62, %c128], %167 {strides = array<i32>} : memref<8x256xf32, #tpu.memory_space<vmem>>, vector<8x128xf32>,
    return
  }
  func.func @transform_1(%arg0: i32, %arg1: memref<16xi32, #tpu.memory_space<smem>>, %arg2: memref<16xi32, #tpu.memory_space<smem>>, %arg3: memref<4xi32, #tpu.memory_space<smem>>) -> (i32, i32) {
    %c0_i32 = arith.constant 0 : i32
    %c0_i32_0 = arith.constant 0 : i32
    return %c0_i32, %arg0 : i32, i32
  }
}

</mosaic_0001>

<bundles_post_ra>
// kernel: tpu_custom_call.1
= control target key start
LH: loop header
LB: loop body
LE: loop exit
PB: predicated region body
PF: predicated region fallthrough
CT: control target
= control target key end

     0   :  { %s497_s21 = smov [#allocation5]   ;;  %s498_s22 = smov [#allocation6]   ;;  %s653_s0 = inlined_call_operand.vmem [shape: s32[16], index: 0, kind: input, shape index: {}]   ;;  %s654_s3 = inlined_call_operand.vmem [shape: f32[43,32], index: 3, kind: input, shape index: {}]   ;;  %s655_s4 = inlined_call_operand.hbm [shape: f32[8,512], index: 4, kind: output, shape index: {}]   ;;  %s656_s1 = inlined_call_operand.vmem [shape: s32[16], index: 1, kind: input, shape index: {}]   ;;  %s657_s2 = inlined_call_operand.vmem [shape: s32[4], index: 2, kind: input, shape index: {}]  }
   0x1   :  { %s10_s17 = sshll.u32 %s653_s0, 4  ;;  %s15_s20 = sshll.u32 %s656_s1, 4  ;;  %s11_s17 = int_to_ptr.vmem [resolvable:$true] %s10_s17  ;;  %s16_s20 = int_to_ptr.vmem [resolvable:$true] %s15_s20 }
   0x2   :  { %13 = dma.vmem_to_smem %s11_s17, 16, %s497_s21, [#allocation4] }
   0x3   :  { %18 = dma.vmem_to_smem %s16_s20, 16, %s498_s22, [#allocation4] }
   0x4   :  { %s20_s25 = sshll.u32 %s657_s2, 4  ;;  %s499_s26 = smov [#allocation7]   ;;  %s21_s25 = int_to_ptr.vmem [resolvable:$true] %s20_s25 }
   0x5   :  { %23 = dma.vmem_to_smem %s21_s25, 16, %s499_s26, [#allocation4] }
   0x6   :  { %475 = dma.done.wait [#allocation4], 48 }
   0x7   :  { %476 = vsyncadd [#allocation4], 4294967248 }
   0x8   :  { %26 = sfence }
   0x9   :  { %27 = vsyncpa [#allocation9], 0 }
   0xa   :  { %29 = vsyncpa [#allocation9 + $0x1], 0  ;;  %s537_s0 = smov 0   ;;  %s539_s1 = smov 0  }
   0xb   :  { %s541_s27 = smov 0  }
   0xc LB: > { %s344_s2 = sadd.s32 4294967295, %s495_s27   ;;  %s554_s28 = sadd.s32 1, %s495_s27   ;;  %s495_s27 = sphi %s541_s27, %s662_s27   ;;  %s491_s1 = sphi %s539_s1, %s661_s1   ;;  %s487_s0 = sphi %s537_s0, %s660_s0  }
   0xd   : > { %s38_s29 = ssub.s32 %s495_s27, %s554_s28  ;;  %s41_s30 = sadd.s32 1, %s491_s1 }
   0xe   : > { %p39_p0 = scmp.eq.s32.totalorder %s38_s29, 0  ;;  %p345_p1 = scmp.ne.s32.totalorder %s38_s29, 0 }
   0xf   : > { %p45_p2 = scmp.eq.s32.totalorder %s495_s27, 1  ;;  %p50_p3 = scmp.ne.s32.totalorder %s491_s1, %s487_s0 }
  0x10   : > { %s563_s5 = scalar_select %p39_p0, %s491_s1, %s41_s30  }
  0x11   : > { %p565_p4 = por %p345_p1, %p45_p2  ;;  %p51_p5 = scmp.eq.s32.totalorder %s344_s2, 1 }
  0x12   : > { %p346_p7 = scmp.ge.s32.totalorder %s495_s27, 2 }
  0x13   : > { %p569_p6 = por %p51_p5, %p50_p3  ;;  %s65_s8 = sand.u32 (!%p346_p7), 1, %s491_s1  }
  0x14   : > { %60 = sbr.rel (%p346_p7) target bundleno = 324 (0x144), region = 12  ;;  %s348_s9 = sshll.u32 (!%p346_p7), %s495_s27, 1 }
  0x15   : > { %s347_s10 = sshll.u32 (!%p346_p7), %s65_s8, 4  ;;  %s70_s11 = sld [smem:[#allocation7 + %s348_s9]] (!%p346_p7) }
  0x16   : > { %s581_s15 = scalar_lea.vmem (!%p346_p7), [#allocation8], %s347_s10 }
  0x1b   : > { %s71_s14 = scalar_lea.vmem %s654_s3, %s70_s11 }
  0x1c   : > { %v82_v0 = vld [vmem:[%s71_s14] sm:$0xff]  ;;  %v84_v1 = vld [vmem:[%s71_s14 + $0x8] sm:$0xff]  ;;  %v86_v2 = vld [vmem:[%s71_s14 + $0x10] sm:$0xff] }
  0x1d   : > { %83 = vst [vmem:[#allocation2] sm:$0xff] %v82_v0 }
  0x1e   : > { %85 = vst [vmem:[#allocation2 + $0x8] sm:$0xff] %v84_v1 }
  0x1f   : > { %87 = vst [vmem:[#allocation2 + $0x10] sm:$0xff] %v86_v2 }
  0x20   : > { %93 = vsyncadd [#allocation3], 384  ;;  %v94_v3 = vlaneseq  ;;  %s96_s16 = sadd.s32 1, %s348_s9 }
  0x21   : > { %s97_s17 = sld [smem:[#allocation7 + %s96_s16]] }
  0x22   : > { %v583_v4 = vshrl.u32 %v94_v3, 7 }
  0x27   : > { %s98_s20 = scalar_lea.vmem %s654_s3, %s97_s17 }
  0x28   : > { %v111_v5 = vld [vmem:[%s98_s20] sm:$0xff]  ;;  %v113_v6 = vld [vmem:[%s98_s20 + $0x8] sm:$0xff]  ;;  %v115_v7 = vld [vmem:[%s98_s20 + $0x10] sm:$0xff] }
  0x29   : > { %112 = vst [vmem:[#allocation2 + $0x20] sm:$0xff] %v111_v5 }
  0x2a   : > { %114 = vst [vmem:[#allocation2 + $0x28] sm:$0xff] %v113_v6 }
  0x2b   : > { %116 = vst [vmem:[#allocation2 + $0x30] sm:$0xff] %v115_v7 }
  0x2c   : > { %122 = vsyncadd [#allocation3 + $0x1], 384 }
  0x2d   : > { %477 = dma.done.wait [#allocation3], 384 }
  0x2e   : > { %478 = vsyncadd [#allocation3], 4294966912  ;;  %s589_s21 = sshll.u32 %s495_s27, 3  ;;  %s500_s11 = smov 32   ;;  %vm179_vm4 = vcmask 261120   ;;  %vm181_vm5 = vcmask 523264  }
  0x2f   : > { %s137_s22 = sadd.s32 1, %s589_s21  ;;  %s147_s23 = sadd.s32 2, %s589_s21  ;;  %vm183_vm6 = vcmask 785408  }
  0x30   : > { %s138_s24 = sld [smem:[#allocation5 + %s137_s22]]  ;;  %s157_s26 = sadd.s32 3, %s589_s21 }
  0x31   : > { %s139_s25 = sld [smem:[#allocation6 + %s137_s22]]  ;;  %s501_s14 = smov 96  }
  0x32   : > { %s148_s2 = sld [smem:[#allocation5 + %s147_s23]]  ;;  %s502_s16 = smov 64  }
  0x33   : > { %s149_s29 = sld [smem:[#allocation6 + %s147_s23]] }
  0x34   : > { %s158_s30 = sld [smem:[#allocation5 + %s157_s26]] }
  0x35   : > { %s159_s9 = sld [smem:[#allocation6 + %s157_s26]] }
  0x36   : > { %v142_v8 = vstv %s138_s24  ;;  %s128_s17 = sld [smem:[#allocation5 + %s589_s21]] }
  0x37   : > { %vm143_vm0 = vcmp.lt.s32.totalorder %v583_v4, %v142_v8  ;;  %s140_s10 = scalar_lea.vmem [#allocation2], %s139_s25  ;;  %s129_s18 = sld [smem:[#allocation6 + %s589_s21]] }
  0x38   : > { %v141_v9 = vld [vmem:[%s140_s10] sm:$0xff]  ;;  %v152_v11 = vstv %s148_s2 }
  0x39   : > { %v146_v10 = vsel %vm143_vm0, %v141_v9, 0.0  ;;  %s150_s12 = scalar_lea.vmem [#allocation2], %s149_s29  ;;  %vm153_vm2 = vcmp.lt.s32.totalorder %v583_v4, %v152_v11 }
  0x3a   : > { %168 = vrot.lane.b32.xlu0 %v146_v10, %s500_s11  ;;  %v162_v12 = vstv %s158_s30  ;;  %v151_v13 = vld [vmem:[%s150_s12] sm:$0xff] }
  0x3b   : > { %vm163_vm1 = vcmp.lt.s32.totalorder %v583_v4, %v162_v12  ;;  %s160_s13 = scalar_lea.vmem [#allocation2], %s159_s9  ;;  %v156_v16 = vsel %vm153_vm2, %v151_v13, 0.0 }
  0x3c   : > { %v161_v14 = vld [vmem:[%s160_s13] sm:$0xff]  ;;  %v132_v17 = vstv %s128_s17 }
  0x3d   : > { %v166_v15 = vsel %vm163_vm1, %v161_v14, 0.0  ;;  %s130_s19 = scalar_lea.vmem [#allocation2], %s129_s18  ;;  %vm133_vm3 = vcmp.lt.s32.totalorder %v583_v4, %v132_v17 }
  0x3e   : > { %176 = vrot.lane.b32.xlu1 %v166_v15, %s501_s14  ;;  %v131_v19 = vld [vmem:[%s130_s19] sm:$0xff] }
  0x3f   : > { %v136_v20 = vsel %vm133_vm3, %v131_v19, 0.0 }
  0x42   : > { %172 = vrot.lane.b32.xlu0 %v156_v16, %s502_s16 }
  0xac   : > { %v169_v18 = vpop.permute.xlu0 %168 }
  0xad   : > { %v180_v22 = vsel %vm179_vm4, %v136_v20, %v169_v18 }
  0xb0   : > { %v177_v21 = vpop.permute.xlu1 %176 }
  0xb4   : > { %v173_v23 = vpop.permute.xlu0 %172 }
  0xb5   : > { %v182_v24 = vsel %vm181_vm5, %v180_v22, %v173_v23 }
  0xb6   : > { %v184_v25 = vsel %vm183_vm6, %v182_v24, %v177_v21 }
  0xb7   : > { %185 = vst [vmem:[%s581_s15] sm:$0xff] %v184_v25 }
  0xb8   : > { %479 = dma.done.wait [#allocation3 + $0x1], 384 }
  0xb9   : > { %480 = vsyncadd [#allocation3 + $0x1], 4294966912  ;;  %s200_s20 = sadd.s32 5, %s589_s21  ;;  %s211_s22 = sadd.s32 6, %s589_s21 }
  0xba   : > { %s201_s23 = sld [smem:[#allocation5 + %s200_s20]]  ;;  %s222_s25 = sadd.s32 7, %s589_s21 }
  0xbb   : > { %s202_s24 = sld [smem:[#allocation6 + %s200_s20]]  ;;  %s189_s13 = sadd.s32 4, %s589_s21 }
  0xbc   : > { %s212_s26 = sld [smem:[#allocation5 + %s211_s22]]  ;;  %s361_s18 = sshll.u32 %s495_s27, 4 }
  0xbd   : > { %s213_s2 = sld [smem:[#allocation6 + %s211_s22]]  ;;  %s250_s21 = scalar_lea.sflag [#allocation9], %s65_s8 }
  0xbe   : > { %s223_s29 = sld [smem:[#allocation5 + %s222_s25]] }
  0xbf   : > { %s224_s30 = sld [smem:[#allocation6 + %s222_s25]] }
  0xc0   : > { %v206_v26 = vstv %s201_s23  ;;  %s190_s17 = sld [smem:[#allocation5 + %s189_s13]]  ;;  %s261_s23 = scalar_lea.hbm %s655_s4, %s361_s18 }
  0xc1   : > { %vm207_vm7 = vcmp.lt.s32.totalorder %v583_v4, %v206_v26  ;;  %s311_s9 = scalar_lea.vmem [#allocation2], %s202_s24 }
  0xc2   : > { %v351_v27 = vld [vmem:[%s311_s9 + $0x20] sm:$0xff]  ;;  %v217_v29 = vstv %s212_s26 }
  0xc3   : > { %v210_v28 = vsel %vm207_vm7, %v351_v27, 0.0  ;;  %s313_s10 = scalar_lea.vmem [#allocation2], %s213_s2  ;;  %vm218_vm9 = vcmp.lt.s32.totalorder %v583_v4, %v217_v29 }
  0xc4   : > { %234 = vrot.lane.b32.xlu0 %v210_v28, %s500_s11  ;;  %v228_v30 = vstv %s223_s29  ;;  %v352_v31 = vld [vmem:[%s313_s10 + $0x20] sm:$0xff]  ;;  %s191_s11 = sld [smem:[#allocation6 + %s189_s13]]  ;;  %s455_s29 = scalar_lea.hbm %s655_s4, 32 }
  0xc5   : > { %vm229_vm8 = vcmp.lt.s32.totalorder %v583_v4, %v228_v30  ;;  %s315_s12 = scalar_lea.vmem [#allocation2], %s224_s30  ;;  %v221_v34 = vsel %vm218_vm9, %v352_v31, 0.0 }
  0xc6   : > { %v353_v32 = vld [vmem:[%s315_s12 + $0x20] sm:$0xff]  ;;  %v195_v35 = vstv %s190_s17 }
  0xc7   : > { %v232_v33 = vsel %vm229_vm8, %v353_v32, 0.0  ;;  %vm196_vm10 = vcmp.lt.s32.totalorder %v583_v4, %v195_v35 }
  0xc8   : > { %242 = vrot.lane.b32.xlu1 %v232_v33, %s501_s14  ;;  %s263_s14 = sshll.u32 %s581_s15, 4  ;;  %s264_s14 = int_to_ptr.vmem [resolvable:$true] %s263_s14 }
  0xca   : > { %s309_s19 = scalar_lea.vmem [#allocation2], %s191_s11 }
  0xcb   : > { %v350_v37 = vld [vmem:[%s309_s19 + $0x20] sm:$0xff] }
  0xcc   : > { %238 = vrot.lane.b32.xlu0 %v221_v34, %s502_s16  ;;  %v199_v38 = vsel %vm196_vm10, %v350_v37, 0.0  ;;  %s265_s16 = sshll.u32 %s261_s23, 4  ;;  %s266_s16 = int_to_ptr.hbm [resolvable:$true] %s265_s16 }
  0xcd   : > { %s449_s24 = sshra.s32 %s266_s16, 4  ;;  %s450_s24 = int_to_ptr.hbm [resolvable:$true] %s449_s24 }
  0xce   : > { %s451_s25 = scalar_lea.hbm %s450_s24, 16  ;;  %p456_p11 = scmp.lt.s32.totalorder %s450_s24, %s655_s4 }
  0xcf   : > { %p452_p8 = scmp.ne.s32.totalorder %s450_s24, %s451_s25  ;;  %p457_p12 = scmp.lt.s32.totalorder %s455_s29, %s451_s25 }
  0xd1   : > { %p453_p9 = pnand %p452_p8, %p565_p4  ;;  %p458_p13 = por %p457_p12, %p456_p11 }
  0xd3   : > { %p454_p10 = pneg %p453_p9 }
  0xd5   : > { %p459_p0 = pnand %p458_p13, %p454_p10 }
 0x136   : > { %v235_v36 = vpop.permute.xlu0 %234 }
 0x137   : > { %v245_v40 = vsel %vm179_vm4, %v199_v38, %v235_v36 }
 0x13a   : > { %v243_v39 = vpop.permute.xlu1 %242 }
 0x13e   : > { %v239_v41 = vpop.permute.xlu0 %238 }
 0x13f   : > { %v246_v42 = vsel %vm181_vm5, %v245_v40, %v239_v41 }
 0x140   : > { %v247_v43 = vsel %vm183_vm6, %v246_v42, %v243_v39 }
 0x141   : > { %248 = vst [vmem:[%s581_s15 + $0x8] sm:$0xff] %v247_v43 }
 0x142   : > { %462 = shalt.err (!%p459_p0)
}
 0x143   : > { %362 = dma.vmem_to_hbm [thread:$0]  (%p565_p4), %s264_s14, 256, %s266_s16, %s250_s21  }
 0x144 PF: > { %p368_p1 = scmp.ge.s32.totalorder %s495_s27, 1  ;;  %s277_s8 = sand.u32 1, %s487_s0  }
 0x145   : > { %s278_s15 = scalar_lea.sflag [#allocation9], %s277_s8 }
 0x146   : > { %p365_p2 = pnand %p368_p1, %p569_p6 }
 0x148   : > { %p366_p3 = pneg %p365_p2 }
 0x14a   : > { %482 = dma.done.wait (%p366_p3), %s278_s15, 256  }
 0x14b   : > { %484 = vsyncadd (%p366_p3), %s278_s15, 4294967040  ;;  %p32_p5 = scmp.ge.s32.totalorder %s554_s28, 3   ;;  %s660_s0 = smov %s491_s1 }
 0x14c   : > { %s661_s1 = smov %s563_s5  ;;  %s662_s27 = smov %s554_s28 }
 0x14d   :  { %34 = sbr.rel (!%p32_p5) target bundleno = 12 (0xc), region = 103 }
 0x152   :  { %284 = vsyncpa [#allocation9], 1 }
 0x153   :  { %286 = vsyncpa [#allocation9 + $0x1], 1 }
 0x154   :  { %287 = vsyncmov [#allocation3] }
 0x157   :  { %s288_s27 = vpop.sfrf %287 }
 0x158   :  { %p359_p4 = scmp.ne.s32.totalorder %s288_s27, 0 }
 0x15a   :  { %292 = shalt.err (%p359_p4)  }
 0x15b   :  { %294 = vsyncmov [#allocation3 + $0x1] }
 0x15e   :  { %s295_s6 = vpop.sfrf %294 }
 0x15f   :  { %p360_p6 = scmp.ne.s32.totalorder %s295_s6, 0 }
 0x161   :  { %299 = shalt.err (%p360_p6)  }

</bundles_post_ra>
